<compile_context>
chip_gen: v7x
topology: tpu7x:2x2x1
jax: 0.10.0
libtpu: 0.0.40
codegen_flags: <defaults>
</compile_context>

<pallas_src>
import functools

import jax
import jax.numpy as jnp
from jax import lax
from jax.experimental import pallas as pl
from jax.experimental.pallas import tpu as pltpu

LANE = 128
SUBLANE = 8


def _ohem_kernel(x_ref, t_ref, out_ref, key_ref, cnt_ref, *, tile_rows, num_tiles, k):
    """x_ref, t_ref: (tile_rows, 128) f32 tiles streamed from HBM.
    out_ref: (1, 1) f32 SMEM. key_ref: (num_tiles*tile_rows, 128) int32 VMEM scratch.
    cnt_ref: (4,) int32 SMEM scratch for the streamed bit-30/29 prefix counts."""
    i = pl.program_id(0)

    # ---------------- Phase 1: per-tile key build (streamed) ----------------
    @pl.when(i == 0)
    def _():
        cnt_ref[0] = jnp.int32(0)
        cnt_ref[1] = jnp.int32(0)
        cnt_ref[2] = jnp.int32(0)

    d = x_ref[...] - t_ref[...]
    loss = d * d                                      # MSE, always >= 0
    key = pltpu.bitcast(loss, jnp.int32)              # order-preserving for loss >= 0
    row0 = pl.multiple_of(i * tile_rows, tile_rows)
    key_ref[pl.ds(row0, tile_rows), :] = key

    # Pre-resolve radix bits 30/29: counts for the 3 possible (data-independent)
    # candidates n<<29.  Phase 1 is HBM-DMA bound, so this rides in the VALU slack.
    for idx, cand in enumerate((1 << 29, 2 << 29, 3 << 29)):
        c = jnp.sum((key >= jnp.int32(cand)).astype(jnp.int32))
        cnt_ref[idx] = cnt_ref[idx] + c

    # ------------- Phase 2 (last step): radix select + top-k mean -------------
    @pl.when(i == pl.num_programs(0) - 1)
    def _():
        k_i = jnp.int32(k)
        ones_lhs = jnp.ones((SUBLANE, tile_rows), jnp.bfloat16)   # hoisted constant

        def count_ge(cand):
            """count(key >= cand) over the whole key scratch, chunk by chunk.
            The big add-tree runs on the MXU (rows are the contraction dim); chunk
            partial counts are exact in f32 and accumulated exactly in int32."""
            def body(c, acc):
                r0 = pl.multiple_of(c * tile_rows, tile_rows)
                kc = key_ref[pl.ds(r0, tile_rows), :]
                m = (kc >= cand).astype(jnp.bfloat16)
                # (8, tile_rows) @ (tile_rows, 128): every output row is the
                # per-lane count row (LHS is all-ones).
                o = jnp.dot(ones_lhs, m, preferred_element_type=jnp.float32)
                part = jnp.sum(o) * jnp.float32(1.0 / SUBLANE)
                return acc + part.astype(jnp.int32)
            return lax.fori_loop(0, num_tiles, body, jnp.int32(0))

        # Bits 30/29 from the streamed prefix counts.  Every candidate below is > 0,
        # so zero-padded keys are never counted anywhere.
        c1, c2, c3 = cnt_ref[0], cnt_ref[1], cnt_ref[2]
        bit30 = c2 >= k_i
        result = jnp.where(bit30, jnp.int32(1 << 30), jnp.int32(0))
        cnt29 = jnp.where(bit30, c3, c1)
        result = jnp.where(cnt29 >= k_i, result | jnp.int32(1 << 29), result)

        # Remaining bits 28..0: greedy MSB-first search for the largest value v with
        # count(key >= v) >= k.  That maximum is exactly the k-th largest key, so
        # `result` ends as its exact bit pattern.
        def bit_body(j, res):
            bit = jnp.left_shift(jnp.int32(1), jnp.int32(28) - j)
            cand = res | bit
            return jnp.where(count_ge(cand) >= k_i, cand, res)

        result = lax.fori_loop(0, 29, bit_body, result)

        # Fused final pass: sum & count of losses strictly above the threshold plus
        # the threshold value itself (masked max), all from one read of the scratch.
        def final_body(c, carry):
            s_gt, n_gt, thr = carry
            r0 = pl.multiple_of(c * tile_rows, tile_rows)
            kc = key_ref[pl.ds(r0, tile_rows), :]
            lc = pltpu.bitcast(kc, jnp.float32)
            gt = kc > result
            s_gt = s_gt + jnp.sum(jnp.where(gt, lc, jnp.float32(0.0)))
            n_gt = n_gt + jnp.sum(gt.astype(jnp.int32))
            thr = jnp.maximum(
                thr, jnp.max(jnp.where(kc == result, lc, jnp.float32(0.0))))
            return s_gt, n_gt, thr

        # TODO(synk): s_gt is a plain f32 running sum; for extremely large inputs a
        # compensated / hierarchical accumulation would tighten the tolerance.
        s_gt, n_gt, thr = lax.fori_loop(
            0, num_tiles, final_body,
            (jnp.float32(0.0), jnp.int32(0), jnp.float32(0.0)))

        # mean(top-k): the kept elements are everything strictly > thr plus
        # (k - n_gt) copies of thr (exact for any tie pattern; padding adds 0).
        k_f = jnp.float32(k)
        out_ref[0, 0] = (s_gt + (k_f - n_gt.astype(jnp.float32)) * thr) / k_f


def _vmem_capacity_bytes():
    """Physical VMEM per TensorCore; conservative fallback if the query fails."""
    try:
        cap = int(pltpu.get_tpu_info().vmem_capacity_bytes)
        if cap > 0:
            return cap
    except Exception:
        pass
    return 64 << 20   # v7x per-TC size: the smallest of current generations


def ohem_loss(inputs, targets, keep_ratio=0.7, max_tile_rows=1024):
    """Pallas TPU implementation of OHEM over MSELoss(reduction='none')."""
    assert inputs.shape == targets.shape
    n = int(inputs.size)
    assert n < 2**31, "int32 element counts inside the kernel would overflow"
    k = int(keep_ratio * n)                          # matches Python int() truncation
    assert k >= 1, "keep_ratio * numel must be >= 1"

    x = inputs.reshape(-1).astype(jnp.float32)
    t = targets.reshape(-1).astype(jnp.float32)

    # Lane-align and choose a tile size (multiple of 8 sublanes, or the full extent).
    rows = -(-n // LANE)
    rows = -(-rows // SUBLANE) * SUBLANE
    tile_rows = min(max_tile_rows, rows)
    n_rows = -(-rows // tile_rows) * tile_rows
    n_pad = n_rows * LANE
    if n_pad != n:                                   # only pad when actually needed
        x = jnp.pad(x, (0, n_pad - n))
        t = jnp.pad(t, (0, n_pad - n))
    x2 = x.reshape(n_rows, LANE)
    t2 = t.reshape(n_rows, LANE)
    num_tiles = n_rows // tile_rows

    # Explicit VMEM budget: resident key scratch + double-buffered input tiles +
    # epilogue chunk-sized temporaries, clamped to 90% of the physical VMEM of the
    # running generation (64 MiB/TC on v7x, 128 MiB on v5e/v6e).
    key_bytes = n_rows * LANE * 4
    tile_bytes = tile_rows * LANE * 4
    vmem_needed = key_bytes + 4 * tile_bytes + 3 * tile_bytes + (2 << 20)
    vmem_cap = _vmem_capacity_bytes()
    vmem_limit = int(min(max(vmem_needed, 16 << 20), int(vmem_cap * 0.9)))
    if vmem_needed > vmem_limit:
        # TODO(synk): add a two-level path (coarse exponent histogram while streaming,
        # keys spilled to HBM, single refinement re-stream) for inputs whose keys do
        # not fit in VMEM; for now fail loudly instead of compiling a broken kernel.
        raise ValueError(
            f"OHEM kernel needs ~{vmem_needed >> 20} MiB of VMEM for {n} elements "
            f"but only ~{vmem_limit >> 20} MiB is usable on this TPU generation.")

    kernel = functools.partial(_ohem_kernel, tile_rows=tile_rows,
                               num_tiles=num_tiles, k=k)
    out = pl.pallas_call(
        kernel,
        out_shape=jax.ShapeDtypeStruct((1, 1), jnp.float32),
        grid_spec=pltpu.PrefetchScalarGridSpec(
            num_scalar_prefetch=0,
            grid=(num_tiles,),
            in_specs=[
                pl.BlockSpec((tile_rows, LANE), lambda i: (i, 0)),
                pl.BlockSpec((tile_rows, LANE), lambda i: (i, 0)),
            ],
            out_specs=pl.BlockSpec(
                (1, 1), lambda i: (0, 0), memory_space=pltpu.MemorySpace.SMEM
            ),
            scratch_shapes=[
                pltpu.VMEM((n_rows, LANE), jnp.int32),
                pltpu.SMEM((4,), jnp.int32),
            ],
        ),
        compiler_params=pltpu.CompilerParams(
            # Final step consumes keys/counts written by all earlier steps -> sequential.
            # TODO(synk): on v7x this could be core-parallel with per-bit scalar exchange.
            dimension_semantics=("arbitrary",),
            vmem_limit_bytes=vmem_limit,
        ),
    )(x2, t2)
    return out[0, 0]


def ohem_loss_reference(inputs, targets, keep_ratio=0.7):
    """Pure-JAX reference mirroring the PyTorch forward (with MSE as loss_fn)."""
    loss = ((inputs - targets) ** 2).reshape(-1).astype(jnp.float32)
    k = int(keep_ratio * loss.size)
    sorted_desc = jnp.sort(loss)[::-1]
    return jnp.mean(sorted_desc[:k])


if __name__ == "__main__":
    key = jax.random.PRNGKey(0)
    k1, k2 = jax.random.split(key)
    # NCHW, as in the PyTorch convention.
    inputs = jax.random.normal(k1, (2, 4, 16, 16), dtype=jnp.float32)
    targets = (jax.random.uniform(k2, (2, 4, 16, 16)) > 0.5).astype(jnp.float32)

    out = ohem_loss(inputs, targets, keep_ratio=0.7)
    out = jax.block_until_ready(out)

    ref = jax.block_until_ready(ohem_loss_reference(inputs, targets, keep_ratio=0.7))
    assert jnp.allclose(out, ref, rtol=1e-5, atol=1e-6), (out, ref)

    print("KERNEL_OK")
</pallas_src>

<mosaic_0001>
module attributes {stable_mosaic.version = 11 : i64} {
  func.func @_ohem_kernel(%arg0: i32, %arg1: memref<16x128xf32, #tpu.memory_space<vmem>>, %arg2: memref<16x128xf32, #tpu.memory_space<vmem>>, %arg3: memref<1x1xf32, #tpu.memory_space<smem>>, %arg4: memref<16x128xi32, #tpu.memory_space<vmem>>, %arg5: memref<4xi32, #tpu.memory_space<smem>>) attributes {dimension_semantics = [#tpu.dimension_semantics<arbitrary>], iteration_bounds = array<i64: 1>, scalar_prefetch = 0 : i64, scratch_operands = 2 : i64, tpu.core_type = #tpu.core_type<tc>, window_params = [{transform_indices = @transform_0, window_bounds = array<i64: 16, 128>}, {transform_indices = @transform_1, window_bounds = array<i64: 16, 128>}, {transform_indices = @transform_2, window_bounds = array<i64: 1, 1>}]} {
    %c0_i32 = arith.constant 0 : i32
    %0 = arith.cmpi eq, %arg0, %c0_i32 : i32
    %1 = arith.extui %0 : i1 to i32
    %c0_i32_0 = arith.constant 0 : i32
    %2 = arith.cmpi ne, %1, %c0_i32_0 : i32
    scf.if %2 {
      %c0_i32_13 = arith.constant 0 : i32
      %c0_14 = arith.constant 0 : index
      %45 = memref.load %arg5[%c0_14] : memref<4xi32, #tpu.memory_space<smem>>
      memref.store %c0_i32_13, %arg5[%c0_14] : memref<4xi32, #tpu.memory_space<smem>>
      %c0_i32_15 = arith.constant 0 : i32
      %c1_16 = arith.constant 1 : index
      %46 = memref.load %arg5[%c1_16] : memref<4xi32, #tpu.memory_space<smem>>
      memref.store %c0_i32_15, %arg5[%c1_16] : memref<4xi32, #tpu.memory_space<smem>>
      %c0_i32_17 = arith.constant 0 : i32
      %c2_18 = arith.constant 2 : index
      %47 = memref.load %arg5[%c2_18] : memref<4xi32, #tpu.memory_space<smem>>
      memref.store %c0_i32_17, %arg5[%c2_18] : memref<4xi32, #tpu.memory_space<smem>>
    } else {
    }
    %c0 = arith.constant 0 : index
    %c0_1 = arith.constant 0 : index
    %3 = vector.load %arg1[%c0, %c0_1] : memref<16x128xf32, #tpu.memory_space<vmem>>, vector<16x128xf32>
    %c0_2 = arith.constant 0 : index
    %c0_3 = arith.constant 0 : index
    %4 = vector.load %arg2[%c0_2, %c0_3] : memref<16x128xf32, #tpu.memory_space<vmem>>, vector<16x128xf32>
    %5 = arith.subf %3, %4 : vector<16x128xf32>
    %6 = arith.mulf %5, %5 : vector<16x128xf32>
    %7 = tpu.bitcast %6 : vector<16x128xf32> -> vector<16x128xi32>
    %c16_i32 = arith.constant 16 : i32
    %8 = arith.muli %arg0, %c16_i32 : i32
    %9 = tpu.assume_multiple %8, 16 : i32
    %10 = arith.index_cast %9 : i32 to index
    %c0_4 = arith.constant 0 : index
    %11 = vector.load %arg4[%10, %c0_4] : memref<16x128xi32, #tpu.memory_space<vmem>>, vector<16x128xi32>
    tpu.vector_store %arg4[%10, %c0_4], %7 {strides = array<i32>} : memref<16x128xi32, #tpu.memory_space<vmem>>, vector<16x128xi32>,
    %c536870912_i32 = arith.constant 536870912 : i32
    %12 = vector.broadcast %c536870912_i32 : i32 to vector<16x128xi32>
    %13 = arith.cmpi sge, %7, %12 : vector<16x128xi32>
    %14 = arith.extui %13 : vector<16x128xi1> to vector<16x128xi32>
    %15 = vector.shape_cast %14 : vector<16x128xi32> to vector<1x16x128xi32>
    %cst = arith.constant dense<0> : vector<1xi32>
    %16 = vector.multi_reduction <add>, %15, %cst [1, 2] : vector<1x16x128xi32> to vector<1xi32>
    %17 = vector.shape_cast %16 : vector<1xi32> to vector<1x1x1xi32>
    %18 = vector.extract %17[0, 0, 0] : i32 from vector<1x1x1xi32>
    %c0_5 = arith.constant 0 : index
    %19 = memref.load %arg5[%c0_5] : memref<4xi32, #tpu.memory_space<smem>>
    %20 = arith.addi %19, %18 : i32
    %c0_6 = arith.constant 0 : index
    %21 = memref.load %arg5[%c0_6] : memref<4xi32, #tpu.memory_space<smem>>
    memref.store %20, %arg5[%c0_6] : memref<4xi32, #tpu.memory_space<smem>>
    %c1073741824_i32 = arith.constant 1073741824 : i32
    %22 = vector.broadcast %c1073741824_i32 : i32 to vector<16x128xi32>
    %23 = arith.cmpi sge, %7, %22 : vector<16x128xi32>
    %24 = arith.extui %23 : vector<16x128xi1> to vector<16x128xi32>
    %25 = vector.shape_cast %24 : vector<16x128xi32> to vector<1x16x128xi32>
    %cst_7 = arith.constant dense<0> : vector<1xi32>
    %26 = vector.multi_reduction <add>, %25, %cst_7 [1, 2] : vector<1x16x128xi32> to vector<1xi32>
    %27 = vector.shape_cast %26 : vector<1xi32> to vector<1x1x1xi32>
    %28 = vector.extract %27[0, 0, 0] : i32 from vector<1x1x1xi32>
    %c1 = arith.constant 1 : index
    %29 = memref.load %arg5[%c1] : memref<4xi32, #tpu.memory_space<smem>>
    %30 = arith.addi %29, %28 : i32
    %c1_8 = arith.constant 1 : index
    %31 = memref.load %arg5[%c1_8] : memref<4xi32, #tpu.memory_space<smem>>
    memref.store %30, %arg5[%c1_8] : memref<4xi32, #tpu.memory_space<smem>>
    %c1610612736_i32 = arith.constant 1610612736 : i32
    %32 = vector.broadcast %c1610612736_i32 : i32 to vector<16x128xi32>
    %33 = arith.cmpi sge, %7, %32 : vector<16x128xi32>
    %34 = arith.extui %33 : vector<16x128xi1> to vector<16x128xi32>
    %35 = vector.shape_cast %34 : vector<16x128xi32> to vector<1x16x128xi32>
    %cst_9 = arith.constant dense<0> : vector<1xi32>
    %36 = vector.multi_reduction <add>, %35, %cst_9 [1, 2] : vector<1x16x128xi32> to vector<1xi32>
    %37 = vector.shape_cast %36 : vector<1xi32> to vector<1x1x1xi32>
    %38 = vector.extract %37[0, 0, 0] : i32 from vector<1x1x1xi32>
    %c2 = arith.constant 2 : index
    %39 = memref.load %arg5[%c2] : memref<4xi32, #tpu.memory_space<smem>>
    %40 = arith.addi %39, %38 : i32
    %c2_10 = arith.constant 2 : index
    %41 = memref.load %arg5[%c2_10] : memref<4xi32, #tpu.memory_space<smem>>
    memref.store %40, %arg5[%c2_10] : memref<4xi32, #tpu.memory_space<smem>>
    %c0_i32_11 = arith.constant 0 : i32
    %42 = arith.cmpi eq, %arg0, %c0_i32_11 : i32
    %43 = arith.extui %42 : i1 to i32
    %c0_i32_12 = arith.constant 0 : i32
    %44 = arith.cmpi ne, %43, %c0_i32_12 : i32
    scf.if %44 {
      %cst_13 = arith.constant 1.000000e+00 : bf16
      %45 = vector.broadcast %cst_13 : bf16 to vector<8x16xbf16>
      %c0_14 = arith.constant 0 : index
      %46 = memref.load %arg5[%c0_14] : memref<4xi32, #tpu.memory_space<smem>>
      %c1_15 = arith.constant 1 : index
      %47 = memref.load %arg5[%c1_15] : memref<4xi32, #tpu.memory_space<smem>>
      %c2_16 = arith.constant 2 : index
      %48 = memref.load %arg5[%c2_16] : memref<4xi32, #tpu.memory_space<smem>>
      %c1433_i32 = arith.constant 1433 : i32
      %49 = arith.cmpi sge, %47, %c1433_i32 : i32
      %c1073741824_i32_17 = arith.constant 1073741824 : i32
      %c0_i32_18 = arith.constant 0 : i32
      %50 = arith.select %49, %c1073741824_i32_17, %c0_i32_18 : i32
      %51 = arith.select %49, %48, %46 : i32
      %c1433_i32_19 = arith.constant 1433 : i32
      %52 = arith.cmpi sge, %51, %c1433_i32_19 : i32
      %c536870912_i32_20 = arith.constant 536870912 : i32
      %53 = arith.ori %50, %c536870912_i32_20 : i32
      %54 = arith.select %52, %53, %50 : i32
      %c1433_i32_21 = arith.constant 1433 : i32
      %c0_i32_22 = arith.constant 0 : i32
      %c29_i32 = arith.constant 29 : i32
      %55 = arith.addi %c0_i32_22, %c29_i32 : i32
      %c1_i32 = arith.constant 1 : i32
      %56 = scf.for %arg6 = %c0_i32_22 to %55 step %c1_i32 iter_args(%arg7 = %54) -> (i32)  : i32 {
        %c28_i32 = arith.constant 28 : i32
        %92 = arith.subi %c28_i32, %arg6 : i32
        %c1_i32_40 = arith.constant 1 : i32
        %93 = arith.shli %c1_i32_40, %92 : i32
        %94 = arith.ori %arg7, %93 : i32
        %c0_i32_41 = arith.constant 0 : i32
        %c0_i32_42 = arith.constant 0 : i32
        %c16_i32_43 = arith.constant 16 : i32
        %95 = arith.muli %c0_i32_42, %c16_i32_43 : i32
        %96 = tpu.assume_multiple %95, 16 : i32
        %97 = arith.index_cast %96 : i32 to index
        %c0_44 = arith.constant 0 : index
        %98 = vector.load %arg4[%97, %c0_44] : memref<16x128xi32, #tpu.memory_space<vmem>>, vector<16x128xi32>
        %99 = vector.broadcast %94 : i32 to vector<16x128xi32>
        %100 = arith.cmpi sge, %98, %99 : vector<16x128xi32>
        %101 = arith.extui %100 : vector<16x128xi1> to vector<16x128xi32>
        %102 = arith.sitofp %101 : vector<16x128xi32> to vector<16x128xf32>
        %103 = arith.truncf %102 : vector<16x128xf32> to vector<16x128xbf16>
        %cst_45 = arith.constant dense<0.000000e+00> : vector<8x128xf32>
        %104 = tpu.matmul %45, %103, %cst_45 {dimension_numbers = #tpu.dot_dimension_numbers<[1], [0], [0], [1], [0, 0, 1, 1], [], []>} : vector<8x16xbf16>, vector<16x128xbf16>, vector<8x128xf32> -> vector<8x128xf32>
        %105 = vector.shape_cast %104 : vector<8x128xf32> to vector<1x8x128xf32>
        %cst_46 = arith.constant dense<0.000000e+00> : vector<1xf32>
        %106 = vector.multi_reduction <add>, %105, %cst_46 [1, 2] : vector<1x8x128xf32> to vector<1xf32>
        %107 = vector.shape_cast %106 : vector<1xf32> to vector<1x1x1xf32>
        %108 = vector.extract %107[0, 0, 0] : f32 from vector<1x1x1xf32>
        %cst_47 = arith.constant 1.250000e-01 : f32
        %109 = arith.mulf %108, %cst_47 : f32
        %110 = arith.fptosi %109 : f32 to i32
        %111 = arith.addi %c0_i32_41, %110 : i32
        %c1_i32_48 = arith.constant 1 : i32
        %112 = arith.cmpi sge, %111, %c1433_i32_21 : i32
        %113 = arith.select %112, %94, %arg7 : i32
        scf.yield %113 : i32
      }
      %c29_i32_23 = arith.constant 29 : i32
      %cst_24 = arith.constant 0.000000e+00 : f32
      %c0_i32_25 = arith.constant 0 : i32
      %cst_26 = arith.constant 0.000000e+00 : f32
      %c0_i32_27 = arith.constant 0 : i32
      %c16_i32_28 = arith.constant 16 : i32
      %57 = arith.muli %c0_i32_27, %c16_i32_28 : i32
      %58 = tpu.assume_multiple %57, 16 : i32
      %59 = arith.index_cast %58 : i32 to index
      %c0_29 = arith.constant 0 : index
      %60 = vector.load %arg4[%59, %c0_29] : memref<16x128xi32, #tpu.memory_space<vmem>>, vector<16x128xi32>
      %61 = tpu.bitcast %60 : vector<16x128xi32> -> vector<16x128xf32>
      %62 = vector.broadcast %56 : i32 to vector<16x128xi32>
      %63 = arith.cmpi sgt, %60, %62 : vector<16x128xi32>
      %cst_30 = arith.constant 0.000000e+00 : f32
      %64 = vector.broadcast %cst_30 : f32 to vector<16x128xf32>
      %65 = arith.select %63, %61, %64 : vector<16x128xi1>, vector<16x128xf32>
      %66 = vector.shape_cast %65 : vector<16x128xf32> to vector<1x16x128xf32>
      %cst_31 = arith.constant dense<0.000000e+00> : vector<1xf32>
      %67 = vector.multi_reduction <add>, %66, %cst_31 [1, 2] : vector<1x16x128xf32> to vector<1xf32>
      %68 = vector.shape_cast %67 : vector<1xf32> to vector<1x1x1xf32>
      %69 = vector.extract %68[0, 0, 0] : f32 from vector<1x1x1xf32>
      %70 = arith.addf %cst_24, %69 : f32
      %71 = arith.extui %63 : vector<16x128xi1> to vector<16x128xi32>
      %72 = vector.shape_cast %71 : vector<16x128xi32> to vector<1x16x128xi32>
      %cst_32 = arith.constant dense<0> : vector<1xi32>
      %73 = vector.multi_reduction <add>, %72, %cst_32 [1, 2] : vector<1x16x128xi32> to vector<1xi32>
      %74 = vector.shape_cast %73 : vector<1xi32> to vector<1x1x1xi32>
      %75 = vector.extract %74[0, 0, 0] : i32 from vector<1x1x1xi32>
      %76 = arith.addi %c0_i32_25, %75 : i32
      %77 = vector.broadcast %56 : i32 to vector<16x128xi32>
      %78 = arith.cmpi eq, %60, %77 : vector<16x128xi32>
      %cst_33 = arith.constant 0.000000e+00 : f32
      %79 = vector.broadcast %cst_33 : f32 to vector<16x128xf32>
      %80 = arith.select %78, %61, %79 : vector<16x128xi1>, vector<16x128xf32>
      %81 = vector.shape_cast %80 : vector<16x128xf32> to vector<1x16x128xf32>
      %cst_34 = arith.constant dense<0xFF800000> : vector<1xf32>
      %82 = vector.multi_reduction <maximumf>, %81, %cst_34 [1, 2] : vector<1x16x128xf32> to vector<1xf32>
      %83 = vector.shape_cast %82 : vector<1xf32> to vector<1x1x1xf32>
      %84 = vector.extract %83[0, 0, 0] : f32 from vector<1x1x1xf32>
      %85 = arith.maximumf %cst_26, %84 : f32
      %c1_i32_35 = arith.constant 1 : i32
      %86 = arith.sitofp %76 : i32 to f32
      %cst_36 = arith.constant 1.433000e+03 : f32
      %87 = arith.subf %cst_36, %86 : f32
      %88 = arith.mulf %87, %85 : f32
      %89 = arith.addf %70, %88 : f32
      %cst_37 = arith.constant 1.433000e+03 : f32
      %90 = arith.divf %89, %cst_37 : f32
      %c0_38 = arith.constant 0 : index
      %c0_39 = arith.constant 0 : index
      %91 = memref.load %arg3[%c0_38, %c0_39] : memref<1x1xf32, #tpu.memory_space<smem>>
      memref.store %90, %arg3[%c0_38, %c0_39] : memref<1x1xf32, #tpu.memory_space<smem>>
    } else {
    }
    return
  }
  func.func @transform_0(%arg0: i32) -> (i32, i32) {
    %c0_i32 = arith.constant 0 : i32
    %c0_i32_0 = arith.constant 0 : i32
    return %arg0, %c0_i32 : i32, i32
  }
  func.func @transform_1(%arg0: i32) -> (i32, i32) {
    %c0_i32 = arith.constant 0 : i32
    %c0_i32_0 = arith.constant 0 : i32
    return %arg0, %c0_i32 : i32, i32
  }
  func.func @transform_2(%arg0: i32) -> (i32, i32) {
    %c0_i32 = arith.constant 0 : i32
    %c0_i32_0 = arith.constant 0 : i32
    %c0_i32_1 = arith.constant 0 : i32
    return %c0_i32, %c0_i32_0 : i32, i32
  }
}

</mosaic_0001>

<bundles_post_ra>
// kernel: tpu_custom_call.1
= control target key start
LH: loop header
LB: loop body
LE: loop exit
PB: predicated region body
PF: predicated region fallthrough
CT: control target
= control target key end

     0   :  { %7 = vsyncpa [#allocation5], 0  ;;  %s561_s0 = inlined_call_operand.hbm [shape: f32[16,128], index: 0, kind: input, shape index: {}]   ;;  %s562_s1 = inlined_call_operand.hbm [shape: f32[16,128], index: 1, kind: input, shape index: {}]   ;;  %s563_s2 = inlined_call_operand.hbm [shape: f32[1,1], index: 2, kind: output, shape index: {}]  }
   0x1   :  { %8 = vsyncpa [#allocation8], 0 }
   0x2   :  { %9 = vsyncpa [#allocation6], 0  ;;  %s468_s9 = smov [#allocation4]   ;;  %s392_s13 = scalar_lea.hbm %s561_s0, 256 }
   0x3   :  { %s15_s10 = sshll.u32 %s468_s9, 4  ;;  %p393_p0 = scmp.ne.s32.totalorder %s561_s0, %s392_s13  ;;  %s16_s10 = int_to_ptr.vmem [resolvable:$true] %s15_s10 }
   0x4   :  { %p396_p1 = scmp.lt.u32.totalorder %s392_s13, %s561_s0 }
   0x6   :  { %p398_p2 = pnand %p396_p1, %p393_p0 }
   0x8   :  { %401 = shalt.err (!%p398_p2)
}
   0x9   :  { %s402_s18 = scalar_lea.vmem %s16_s10, 256  ;;  %p407_p4 = scmp.lt.s32.totalorder %s16_s10, %s16_s10 }
   0xa   :  { %p403_p3 = scmp.ne.s32.totalorder %s16_s10, %s402_s18  ;;  %p408_p5 = scmp.lt.s32.totalorder %s402_s18, %s402_s18 }
   0xc   :  { %p409_p6 = por %p408_p5, %p407_p4 }
   0xe   :  { %p410_p7 = pnand %p409_p6, %p403_p3 }
  0x10   :  { %413 = shalt.err (!%p410_p7)
}
  0x11   :  { %s469_s19 = smov 128   ;;  %s470_s20 = smov 8  }
  0x12   :  { %21 = dma.hbm_to_vmem [thread:$0]  %s561_s0, 256, %s16_s10, [#allocation5], %s469_s19, %s469_s19, %s470_s20  }
  0x13   :  { %s471_s23 = smov [#allocation7]   ;;  %s414_s27 = scalar_lea.hbm %s562_s1, 256 }
  0x14   :  { %s27_s24 = sshll.u32 %s471_s23, 4  ;;  %p415_p8 = scmp.ne.s32.totalorder %s562_s1, %s414_s27  ;;  %s28_s24 = int_to_ptr.vmem [resolvable:$true] %s27_s24 }
  0x15   :  { %p418_p9 = scmp.lt.u32.totalorder %s414_s27, %s562_s1 }
  0x17   :  { %p420_p10 = pnand %p418_p9, %p415_p8 }
  0x19   :  { %423 = shalt.err (!%p420_p10)
}
  0x1a   :  { %s424_s4 = scalar_lea.vmem %s28_s24, 256  ;;  %p429_p12 = scmp.lt.s32.totalorder %s28_s24, %s28_s24 }
  0x1b   :  { %p425_p11 = scmp.ne.s32.totalorder %s28_s24, %s424_s4  ;;  %p430_p13 = scmp.lt.s32.totalorder %s424_s4, %s424_s4 }
  0x1d   :  { %p431_p0 = por %p430_p13, %p429_p12 }
  0x1f   :  { %p432_p1 = pnand %p431_p0, %p425_p11 }
  0x21   :  { %435 = shalt.err (!%p432_p1)
}
  0x22   :  { %33 = dma.hbm_to_vmem [thread:$0]  %s562_s1, 256, %s28_s24, [#allocation8], %s469_s19, %s469_s19, %s470_s20  }
  0x23   :  { %454 = dma.done.wait [#allocation5], 256  }
  0x24   :  { %455 = vsyncadd [#allocation5], 4294967040 }
  0x25   :  { %456 = dma.done.wait [#allocation8], 256  }
  0x26   :  { %457 = vsyncadd [#allocation8], 4294967040  ;;  %v52_v0 = vld [vmem:[#allocation4] sm:$0xff]  ;;  %v53_v1 = vld [vmem:[#allocation4 + $0x8] sm:$0xff]  ;;  %v472_v8 = vmov 0   ;;  %s527_s10 = smov 0  }
  0x27   :  { %v54_v2 = vld [vmem:[#allocation7] sm:$0xff]  ;;  %v55_v3 = vld [vmem:[#allocation7 + $0x8] sm:$0xff] }
  0x28   :  { %v56_v4 = vsub.f32 %v52_v0, %v54_v2  ;;  %v57_v5 = vsub.f32 %v53_v1, %v55_v3 }
  0x2a   :  { %v58_v6 = vmul.f32 %v56_v4, %v56_v4  ;;  %v59_v7 = vmul.f32 %v57_v5, %v57_v5 }
  0x2c   :  { %64 = vst [vmem:[#allocation2] sm:$0xff] %v58_v6  ;;  %vm66_vm0 = vcmp.ge.s32.totalorder %v58_v6, 536870912  ;;  %vm94_vm1 = vcmp.ge.s32.totalorder %v58_v6, 1073741824  ;;  %vm122_vm2 = vcmp.ge.s32.totalorder %v58_v6, 1610612736  ;;  %65 = vst [vmem:[#allocation2 + $0x8] sm:$0xff] %v59_v7  ;;  %vm67_vm3 = vcmp.ge.s32.totalorder %v59_v7, 536870912 }
  0x2d   :  { %v68_v9 = vsel %vm66_vm0, 1, %v472_v8  ;;  %vm95_vm4 = vcmp.ge.s32.totalorder %v59_v7, 1073741824  ;;  %v96_v10 = vsel %vm94_vm1, 1, %v472_v8  ;;  %v69_v11 = vsel %vm67_vm3, 1, %v472_v8 }
  0x2e   :  { %v97_v12 = vsel %vm95_vm4, 1, %v472_v8  ;;  %vm123_vm5 = vcmp.ge.s32.totalorder %v59_v7, 1610612736  ;;  %v124_v13 = vsel %vm122_vm2, 1, %v472_v8  ;;  %v70_v14 = vadd.s32 %v69_v11, %v68_v9 }
  0x2f   :  { %v98_v15 = vadd.s32 %v97_v12, %v96_v10  ;;  %v125_v16 = vsel %vm123_vm5, 1, %v472_v8 }
  0x30   :  { %v126_v17 = vadd.s32 %v125_v16, %v124_v13  ;;  %v72_v18 = vshrl.u32 %v70_v14, 16  ;;  %v71_v19 = vand.u32 65535, %v70_v14 }
  0x31   :  { %v100_v20 = vshrl.u32 %v98_v15, 16  ;;  %v99_v21 = vand.u32 65535, %v98_v15 }
  0x32   :  { %v74_v22 = vcvt.s32.f32 %v72_v18  ;;  %v73_v23 = vcvt.s32.f32 %v71_v19  ;;  %v128_v26 = vshrl.u32 %v126_v17, 16  ;;  %v127_v27 = vand.u32 65535, %v126_v17 }
  0x33   :  { %v102_v24 = vcvt.s32.f32 %v100_v20  ;;  %v101_v25 = vcvt.s32.f32 %v99_v21 }
  0x34   :  { %77 = vadd.xlane.f32.xlu0 %v74_v22  ;;  %75 = vadd.xlane.f32.xlu1 %v73_v23  ;;  %v130_v28 = vcvt.s32.f32 %v128_v26  ;;  %v129_v29 = vcvt.s32.f32 %v127_v27 }
  0x38   :  { %105 = vadd.xlane.f32.xlu0 %v102_v24  ;;  %103 = vadd.xlane.f32.xlu1 %v101_v25 }
  0x3c   :  { %133 = vadd.xlane.f32.xlu0 %v130_v28  ;;  %131 = vadd.xlane.f32.xlu1 %v129_v29 }
  0xc1   :  { %v78_v30 = vpop.xlane.xlu0 %77  ;;  %v76_v31 = vpop.xlane.xlu1 %75 }
  0xc2   :  { %v80_v32 = vcvt.f32.s32 %v78_v30  ;;  %v79_v33 = vcvt.f32.s32 %v76_v31 }
  0xc4   :  { %v81_v34 = vshll.u32 %v80_v32, 16 }
  0xc5   :  { %v106_v35 = vpop.xlane.xlu0 %105  ;;  %v104_v36 = vpop.xlane.xlu1 %103 }
  0xc6   :  { %v82_v37 = vadd.s32 %v81_v34, %v79_v33  ;;  %v108_v38 = vcvt.f32.s32 %v106_v35  ;;  %v107_v39 = vcvt.f32.s32 %v104_v36 }
  0xc8   :  { %v83_v40 = vrot.slane %v82_v37, 4  ;;  %v109_v41 = vshll.u32 %v108_v38, 16 }
  0xc9   :  { %v134_v42 = vpop.xlane.xlu0 %133  ;;  %v132_v43 = vpop.xlane.xlu1 %131 }
  0xca   :  { %v110_v44 = vadd.s32 %v109_v41, %v107_v39  ;;  %v136_v45 = vcvt.f32.s32 %v134_v42  ;;  %v135_v46 = vcvt.f32.s32 %v132_v43  ;;  %v84_v47 = vadd.s32 %v83_v40, %v82_v37 }
  0xcc   :  { %v111_v48 = vrot.slane %v110_v44, 4  ;;  %v137_v49 = vshll.u32 %v136_v45, 16  ;;  %v85_v50 = vrot.slane %v84_v47, 2 }
  0xce   :  { %v112_v51 = vadd.s32 %v111_v48, %v110_v44  ;;  %v138_v52 = vadd.s32 %v137_v49, %v135_v46  ;;  %v86_v53 = vadd.s32 %v85_v50, %v84_v47 }
  0xd0   :  { %v139_v54 = vrot.slane %v138_v52, 4  ;;  %v87_v55 = vrot.slane %v86_v53, 1  ;;  %v113_v56 = vrot.slane %v112_v51, 2 }
  0xd2   :  { %v140_v57 = vadd.s32 %v139_v54, %v138_v52  ;;  %v88_v58 = vadd.s32 %v87_v55, %v86_v53  ;;  %v114_v59 = vadd.s32 %v113_v56, %v112_v51 }
  0xd4   :  { %345 = vpush %v88_v58  ;;  %v115_v60 = vrot.slane %v114_v59, 1  ;;  %v141_v61 = vrot.slane %v140_v57, 2 }
  0xd6   :  { %v116_v62 = vadd.s32 %v115_v60, %v114_v59  ;;  %v142_v63 = vadd.s32 %v141_v61, %v140_v57 }
  0xd8   :  { %347 = vpush %v116_v62  ;;  %v143_v0 = vrot.slane %v142_v63, 1 }
  0xda   :  { %v144_v1 = vadd.s32 %v143_v0, %v142_v63 }
  0xdc   :  { %349 = vpush %v144_v1 }
 0x105   :  { %s346_s1 = spop %345 }
 0x109   :  { %s348_s6 = spop %347 }
 0x10a   :  { %p156_p2 = scmp.ge.s32.totalorder %s348_s6, 1433 }
 0x10c   :  { %s157_s8 = scalar_select %p156_p2, 1073741824, 0 }
 0x10d   :  { %s350_s7 = spop %349 }
 0x10e   :  { %s566_s7 = smov (!%p156_p2, %s350_s7), %s346_s1  ;;  %s160_s9 = sor.u32 536870912, %s157_s8 }
 0x10f   :  { %p159_p3 = scmp.ge.s32.totalorder %s566_s7, 1433 }
 0x111   :  { %s568_s9 = smov (!%p159_p3, %s160_s9), %s157_s8 }
 0x112 LB: > { %v473_v2 = vmov 0.0   ;;  %vm474_vm6 = vmmov 0   ;;  %s169_s11 = ssub.s32 28, %s466_s10  ;;  %s475_s12 = smov 1   ;;  %v172_v3 = vld [vmem:[#allocation2] sm:$0xff]  ;;  %v173_v4 = vld [vmem:[#allocation2 + $0x8] sm:$0xff]  ;;  %s466_s10 = sphi %s527_s10, %s167_s10   ;;  %s462_s9 = sphi %s568_s9, %s564_s9  }
 0x113   : > { %339 = vmatprep.subr.bf16.mxu0 %v473_v2  ;;  %341 = vmatprep.mubr.msk.bf16.mxu0 %vm474_vm6, %v473_v2  ;;  %s170_s13 = sshll.u32 %s475_s12, %s169_s11  ;;  %v476_v6 = vmov 1.0|1.0   ;;  %vm182_vm10 = vcmask 130048   ;;  %v477_v7 = vmov 1065369472   ;;  %s167_s10 = sadd.s32 1, %s466_s10  }
 0x114   : > { %s537_s14 = sor.u32 %s462_s9, %s170_s13  ;;  %p164_p6 = scmp.ge.s32.totalorder %s167_s10, 29  }
 0x115   : > { %v174_v5 = vstv %s537_s14  ;;  %v239_v20 = vld [vmem:[#allocation2] sm:$0xff] (%p164_p6)  ;;  %v240_v21 = vld [vmem:[#allocation2 + $0x8] sm:$0xff] (%p164_p6)  ;;  %s478_s25 = smov (%p164_p6), 0.0   ;;  %s436_s4 = scalar_lea.hbm (%p164_p6), %s563_s2, 16 }
 0x116   : > { %vm175_vm7 = vcmp.ge.s32.totalorder %v172_v3, %v174_v5  ;;  %vm176_vm8 = vcmp.ge.s32.totalorder %v173_v4, %v174_v5  ;;  %p437_p7 = scmp.ne.s32.totalorder (%p164_p6), %s563_s2, %s436_s4  ;;  %p440_p8 = scmp.lt.u32.totalorder (%p164_p6), %s436_s4, %s563_s2 }
 0x117   : > { %vm334_vm9 = vmpackc.low %vm176_vm8, %vm175_vm7 }
 0x118   : > { %340 = vmatpush3.bf16.msk.msra.mxu0 %vm334_vm9, %v476_v6  ;;  %p442_p9 = pnand (%p164_p6), %p440_p8, %p437_p7 }
 0x11b   : > { %342 = vmatmul.mubr.msk.bf16.vlgmr.msra.gmra.mrb[0].mxu0 %vm182_vm10, %v477_v7 }
 0x1ee   : > { %v220_v9 = vpop.f32.mrb[0].mxu0 }
 0x1ef   : > { %v343_v10 = vpop.f32.mrb[1].mxu0  ;;  %226 = vadd.xlane.f32.xlu0 %v220_v9 }
 0x1f0   : > { %v223_v11 = vpop.f32.mrb[2].mxu0 }
 0x1f1   : > { %v344_v12 = vpop.f32.mrb[3].mxu0 }
 0x27c   : > { %v227_v13 = vpop.xlane.xlu0 %226 }
 0x27d   : > { %v228_v14 = vrot.slane %v227_v13, 4 }
 0x27f   : > { %v229_v15 = vadd.f32 %v228_v14, %v227_v13 }
 0x281   : > { %v230_v16 = vrot.slane %v229_v15, 2 }
 0x283   : > { %v231_v17 = vadd.f32 %v230_v16, %v229_v15 }
 0x285   : > { %v232_v18 = vrot.slane %v231_v17, 1 }
 0x287   : > { %v233_v19 = vadd.f32 %v232_v18, %v231_v17 }
 0x289   : > { %351 = vpush %v233_v19 }
 0x2ba   : > { %s352_s15 = spop %351 }
 0x2bb   : > { %s235_s16 = smul.f32 0.125, %s352_s15 }
 0x2bd   : > { %p353_p4 = scmp.lt.s32.totalorder %s235_s16, 0  ;;  %s354_s17 = sceil.f32 %s235_s16 }
 0x2be   : > { %s355_s18 = sfloor.f32 %s235_s16 }
 0x2bf   : > { %s570_s17 = smov (!%p353_p4, %s354_s17), %s355_s18  ;;  %166 = sbr.rel (!%p164_p6) target bundleno = 274 (0x112), region = 59 }
 0x2c0   : > { %s357_s19 = scvt.f32.s32 %s570_s17 }
 0x2c2   : > { %p237_p5 = scmp.ge.s32.totalorder %s357_s19, 1433 }
 0x2c4   : > { %s572_s14 = smov (!%p237_p5, %s537_s14), %s462_s9 }
 0x2c5   : > { %s564_s9 = smov %s572_s14  ;;  %v243_v22 = vstv (%p164_p6), %s572_s14 }
 0x2c6   :  { %vm244_vm11 = vcmp.gt.s32.totalorder %v239_v20, %v243_v22  ;;  %vm245_vm12 = vcmp.gt.s32.totalorder %v240_v21, %v243_v22  ;;  %vm281_vm13 = vcmp.eq.s32.totalorder %v239_v20, %v243_v22  ;;  %vm282_vm14 = vcmp.eq.s32.totalorder %v240_v21, %v243_v22 }
 0x2c7   :  { %v259_v23 = vsel %vm244_vm11, 1, %v472_v8  ;;  %v260_v24 = vsel %vm245_vm12, 1, %v472_v8  ;;  %v246_v25 = vsel %vm244_vm11, %v239_v20, 0.0  ;;  %v247_v26 = vsel %vm245_vm12, %v240_v21, 0.0 }
 0x2c8   :  { %v261_v27 = vadd.s32 %v260_v24, %v259_v23  ;;  %v248_v28 = vadd.f32 %v247_v26, %v246_v25  ;;  %v283_v29 = vsel %vm281_vm13, %v239_v20, 0.0  ;;  %v284_v30 = vsel %vm282_vm14, %v240_v21, 0.0 }
 0x2c9   :  { %v285_v33 = vmax.f32 %v283_v29, %v284_v30 }
 0x2ca   :  { %v263_v31 = vshrl.u32 %v261_v27, 16  ;;  %249 = vadd.xlane.f32.xlu1 %v248_v28  ;;  %v262_v32 = vand.u32 65535, %v261_v27 }
 0x2cc   :  { %v265_v34 = vcvt.s32.f32 %v263_v31  ;;  %v264_v35 = vcvt.s32.f32 %v262_v32 }
 0x2ce   :  { %268 = vadd.xlane.f32.xlu0 %v265_v34  ;;  %286 = vmax.xlane.f32.xlu1 %v285_v33 }
 0x2d2   :  { %266 = vadd.xlane.f32.xlu0 %v264_v35 }
 0x357   :  { %v250_v36 = vpop.xlane.xlu1 %249 }
 0x358   :  { %v251_v37 = vrot.slane %v250_v36, 4 }
 0x35a   :  { %v252_v38 = vadd.f32 %v251_v37, %v250_v36 }
 0x35b   :  { %v269_v39 = vpop.xlane.xlu0 %268  ;;  %v287_v8 = vpop.xlane.xlu1 %286 }
 0x35c   :  { %v271_v40 = vcvt.f32.s32 %v269_v39  ;;  %v253_v41 = vrot.slane %v252_v38, 2  ;;  %v288_v42 = vrot.slane %v287_v8, 4 }
 0x35e   :  { %v254_v43 = vadd.f32 %v253_v41, %v252_v38  ;;  %v289_v45 = vmax.f32 %v287_v8, %v288_v42  ;;  %v272_v46 = vshll.u32 %v271_v40, 16 }
 0x35f   :  { %v267_v44 = vpop.xlane.xlu0 %266 }
 0x360   :  { %v270_v47 = vcvt.f32.s32 %v267_v44  ;;  %v255_v48 = vrot.slane %v254_v43, 1  ;;  %v290_v51 = vrot.slane %v289_v45, 2 }
 0x362   :  { %v273_v49 = vadd.s32 %v272_v46, %v270_v47  ;;  %v256_v50 = vadd.f32 %v255_v48, %v254_v43  ;;  %v291_v54 = vmax.f32 %v289_v45, %v290_v51 }
 0x364   :  { %v274_v52 = vrot.slane %v273_v49, 4  ;;  %358 = vpush %v256_v50  ;;  %v292_v57 = vrot.slane %v291_v54, 1 }
 0x366   :  { %v275_v53 = vadd.s32 %v274_v52, %v273_v49  ;;  %v293_v60 = vmax.f32 %v291_v54, %v292_v57 }
 0x368   :  { %v276_v55 = vrot.slane %v275_v53, 2 }
 0x36a   :  { %v277_v56 = vadd.s32 %v276_v55, %v275_v53 }
 0x36c   :  { %v278_v58 = vrot.slane %v277_v56, 1 }
 0x36e   :  { %v279_v59 = vadd.s32 %v278_v58, %v277_v56 }
 0x370   :  { %360 = vpush %v279_v59 }
 0x371   :  { %362 = vpush %v293_v60 }
 0x395   :  { %s359_s20 = spop %358 }
 0x3a1   :  { %s361_s21 = spop %360 }
 0x3a2   :  { %s296_s22 = scvt.s32.f32 %s361_s21  ;;  %s363_s23 = spop %362 }
 0x3a3   :  { %s295_s26 = smax.f32 %s478_s25, %s363_s23 }
 0x3a4   :  { %s297_s24 = ssub.f32 1433.0, %s296_s22 }
 0x3a6   :  { %s298_s27 = smul.f32 %s297_s24, %s295_s26 }
 0x3a8   :  { %s299_s28 = sadd.f32 %s359_s20, %s298_s27 }
 0x3aa   :  { %s302_s29 = smul.f32 0.0006978367, %s299_s28 }
 0x3ac   :  { %304 = sst [smem:[#allocation9]] %s302_s29 }
 0x3ad   :  { %445 = shalt.err (!%p442_p9)
}
 0x3ae   :  { %s479_s7 = smov [#allocation9]  }
 0x3af   :  { %312 = dma.smem_to_hbm %s479_s7, 16, %s563_s2, [#allocation6]  }
 0x3b0   :  { %458 = dma.done.wait [#allocation6], 16  }
 0x3b1   :  { %459 = vsyncadd [#allocation6], 4294967280 }
 0x3b2   :  { %316 = sfence }
 0x3b3   :  { %317 = vsyncpa [#allocation5], 1 }
 0x3b4   :  { %318 = vsyncpa [#allocation8], 1 }
 0x3b5   :  { %319 = vsyncpa [#allocation6], 1 }

</bundles_post_ra>
